<compile_context>
chip_gen: v7x
topology: tpu7x:2x2x1
jax: 0.10.0
libtpu: 0.0.40
codegen_flags: <defaults>
</compile_context>

<pallas_src>
import functools

import jax
import jax.numpy as jnp
from jax.experimental import pallas as pl
from jax.experimental.pallas import tpu as pltpu


def aspp_pooling_kernel(x_ref, w_ref, bias_ref, o_ref, acc_ref, *, hw):
    # x_ref:    (1, Cin, tile_hw)  input spatial tile (native dtype)
    # w_ref:    (Cout, Cin)        f32, BN scale already folded in
    # bias_ref: (Cout, 1)          f32, folded BN bias
    # o_ref:    (1, Cout, HW)      output block, resident across the k axis
    # acc_ref:  (Cin, 1)           f32 scratch: running per-channel spatial sum
    k = pl.program_id(1)

    @pl.when(k == 0)
    def _init():
        acc_ref[...] = jnp.zeros_like(acc_ref)

    # partial spatial sum for this tile (zero padding contributes nothing)
    x = x_ref[0].astype(jnp.float32)                         # (Cin, tile_hw)
    acc_ref[...] += jnp.sum(x, axis=1, keepdims=True)        # (Cin, 1)

    @pl.when(k == pl.num_programs(1) - 1)
    def _finalize():
        pooled = acc_ref[...] * (1.0 / hw)                   # (Cin, 1)  mean
        # 1x1 conv (BN scale folded into w) == channel matmul
        y = jnp.dot(w_ref[...], pooled,
                    preferred_element_type=jnp.float32)      # (Cout, 1)
        y = jnp.maximum(y + bias_ref[...], 0.0)              # BN bias + ReLU
        cout, hw_out = o_ref.shape[1], o_ref.shape[2]
        # bilinear upsample from 1x1 == broadcast; lane-dense (Cout, HW) store
        o_ref[0] = jnp.broadcast_to(y, (cout, hw_out)).astype(o_ref.dtype)


def _pick_tile_hw(hw, cin, itemsize, budget_bytes=8 * 1024 * 1024):
    """Largest lane-aligned spatial tile whose double-buffered input footprint
    (2 * Cin * tile_hw * itemsize) stays within `budget_bytes`."""
    max_elems = max(128, budget_bytes // max(1, 2 * cin * itemsize))
    if hw <= max_elems:
        return hw, hw                       # single step, full-extent block
    tile = max(128, (max_elems // 128) * 128)
    hw_pad = ((hw + tile - 1) // tile) * tile
    return tile, hw_pad


def aspp_pooling(x, conv_w, bn_gamma, bn_beta, bn_mean, bn_var,
                 eps=1e-5, tile_hw=None):
    """x: (B, C_in, H, W) NCHW.  conv_w: (C_out, C_in, 1, 1).
    Returns (B, C_out, H, W) in x's dtype."""
    B, Cin, H, W = x.shape
    Cout = conv_w.shape[0]
    HW = H * W
    out_dtype = x.dtype

    # glue: fold inference-mode BN into the conv weight and a per-channel bias
    inv_std = 1.0 / jnp.sqrt(bn_var.astype(jnp.float32) + eps)
    scale = bn_gamma.astype(jnp.float32) * inv_std                      # (Cout,)
    w2d = conv_w.reshape(Cout, Cin).astype(jnp.float32) * scale[:, None]
    bias = (bn_beta.astype(jnp.float32)
            - bn_mean.astype(jnp.float32) * scale).reshape(Cout, 1)

    # flatten spatial onto the lane axis; pick / apply a lane-aligned tile
    x_flat = x.reshape(B, Cin, HW)
    if tile_hw is None:
        tile_hw, hw_pad = _pick_tile_hw(HW, Cin, jnp.dtype(x.dtype).itemsize)
    else:
        hw_pad = ((HW + tile_hw - 1) // tile_hw) * tile_hw
    if hw_pad != HW:
        # zero padding leaves the spatial sum unchanged
        x_flat = jnp.pad(x_flat, ((0, 0), (0, 0), (0, hw_pad - HW)))

    kernel = functools.partial(aspp_pooling_kernel, hw=float(HW))

    out = pl.pallas_call(
        kernel,
        out_shape=jax.ShapeDtypeStruct((B, Cout, HW), out_dtype),
        grid_spec=pltpu.PrefetchScalarGridSpec(
            num_scalar_prefetch=0,
            grid=(B, hw_pad // tile_hw),
            in_specs=[
                pl.BlockSpec((1, Cin, tile_hw), lambda b, k: (b, 0, k)),
                pl.BlockSpec((Cout, Cin), lambda b, k: (0, 0)),
                pl.BlockSpec((Cout, 1), lambda b, k: (0, 0)),
            ],
            out_specs=pl.BlockSpec((1, Cout, HW), lambda b, k: (b, 0, 0)),
            scratch_shapes=[pltpu.VMEM((Cin, 1), jnp.float32)],
        ),
        compiler_params=pltpu.CompilerParams(
            dimension_semantics=("parallel", "arbitrary"),
            vmem_limit_bytes=32 * 1024 * 1024,
        ),
    )(x_flat, w2d, bias)
    return out.reshape(B, Cout, H, W)


def aspp_pooling_ref(x, conv_w, bn_gamma, bn_beta, bn_mean, bn_var, eps=1e-5):
    B, Cin, H, W = x.shape
    Cout = conv_w.shape[0]
    xf = x.astype(jnp.float32)
    pooled = jnp.mean(xf, axis=(2, 3))                                  # (B, Cin)
    y = pooled @ conv_w.reshape(Cout, Cin).astype(jnp.float32).T        # (B, Cout)
    y = (y - bn_mean) / jnp.sqrt(bn_var + eps) * bn_gamma + bn_beta
    y = jnp.maximum(y, 0.0)
    return jnp.broadcast_to(y[:, :, None, None], (B, Cout, H, W))


if __name__ == "__main__":
    key = jax.random.PRNGKey(0)
    k_x, k_w, k_x2, k_w2 = jax.random.split(key, 4)

    # Test 1: small ASPP-like shapes (single spatial tile path).
    B, Cin, Cout, H, W = 2, 4, 4, 16, 16
    x = jax.random.normal(k_x, (B, Cin, H, W), dtype=jnp.float32)
    conv_w = jax.random.normal(k_w, (Cout, Cin, 1, 1), dtype=jnp.float32) * 0.1
    bn_gamma = 1.0 + 0.1 * jnp.arange(Cout, dtype=jnp.float32)
    bn_beta = 0.05 * jnp.arange(Cout, dtype=jnp.float32)
    bn_mean = 0.01 * jnp.arange(Cout, dtype=jnp.float32)
    bn_var = 1.0 + 0.02 * jnp.arange(Cout, dtype=jnp.float32)

    out = jax.block_until_ready(
        aspp_pooling(x, conv_w, bn_gamma, bn_beta, bn_mean, bn_var))
    ref = aspp_pooling_ref(x, conv_w, bn_gamma, bn_beta, bn_mean, bn_var)
    assert out.shape == (B, Cout, H, W)
    assert jnp.allclose(out, ref, atol=1e-5, rtol=1e-5)

    # Test 2: non-128-aligned spatial size with forced spatial tiling
    # (exercises the zero-padded multi-step reduction + accumulator path).
    B2, Cin2, Cout2, H2, W2 = 1, 8, 8, 20, 20
    x2 = jax.random.normal(k_x2, (B2, Cin2, H2, W2), dtype=jnp.float32)
    conv_w2 = jax.random.normal(k_w2, (Cout2, Cin2, 1, 1), dtype=jnp.float32) * 0.1
    g2 = 1.0 + 0.1 * jnp.arange(Cout2, dtype=jnp.float32)
    b2 = 0.05 * jnp.arange(Cout2, dtype=jnp.float32)
    m2 = 0.01 * jnp.arange(Cout2, dtype=jnp.float32)
    v2 = 1.0 + 0.02 * jnp.arange(Cout2, dtype=jnp.float32)
    out2 = jax.block_until_ready(
        aspp_pooling(x2, conv_w2, g2, b2, m2, v2, tile_hw=128))
    ref2 = aspp_pooling_ref(x2, conv_w2, g2, b2, m2, v2)
    assert out2.shape == (B2, Cout2, H2, W2)
    assert jnp.allclose(out2, ref2, atol=1e-5, rtol=1e-5)

    print("KERNEL_OK")
</pallas_src>

<mosaic_0001>
module attributes {stable_mosaic.version = 11 : i64} {
  func.func @aspp_pooling_kernel(%arg0: i32, %arg1: i32, %arg2: memref<1x4x256xf32, #tpu.memory_space<vmem>>, %arg3: memref<4x4xf32, #tpu.memory_space<vmem>>, %arg4: memref<4x1xf32, #tpu.memory_space<vmem>>, %arg5: memref<1x4x256xf32, #tpu.memory_space<vmem>>, %arg6: memref<4x1xf32, #tpu.memory_space<vmem>>) attributes {dimension_semantics = [#tpu.dimension_semantics<parallel>, #tpu.dimension_semantics<arbitrary>], iteration_bounds = array<i64: 2, 1>, scalar_prefetch = 0 : i64, scratch_operands = 1 : i64, tpu.core_type = #tpu.core_type<tc>, window_params = [{transform_indices = @transform_0, window_bounds = array<i64: 1, 4, 256>}, {pipeline_mode = #tpu.pipeline_mode<synchronous>, transform_indices = @transform_1, window_bounds = array<i64: 4, 4>}, {pipeline_mode = #tpu.pipeline_mode<synchronous>, transform_indices = @transform_2, window_bounds = array<i64: 4, 1>}, {transform_indices = @transform_3, window_bounds = array<i64: 1, 4, 256>}]} {
    %c0_i32 = arith.constant 0 : i32
    %0 = arith.cmpi eq, %arg1, %c0_i32 : i32
    %1 = arith.extui %0 : i1 to i32
    %c0_i32_0 = arith.constant 0 : i32
    %2 = arith.cmpi ne, %1, %c0_i32_0 : i32
    scf.if %2 {
      %cst_9 = arith.constant 0.000000e+00 : f32
      %13 = vector.broadcast %cst_9 : f32 to vector<4x1xf32>
      %c0_10 = arith.constant 0 : index
      %c0_11 = arith.constant 0 : index
      %14 = vector.load %arg6[%c0_10, %c0_11] : memref<4x1xf32, #tpu.memory_space<vmem>>, vector<4x1xf32>
      tpu.vector_store %arg6[%c0_10, %c0_11], %13 {strides = array<i32>} : memref<4x1xf32, #tpu.memory_space<vmem>>, vector<4x1xf32>,
    } else {
    }
    %c0 = arith.constant 0 : index
    %c0_1 = arith.constant 0 : index
    %c0_2 = arith.constant 0 : index
    %3 = vector.load %arg2[%c0, %c0_1, %c0_2] : memref<1x4x256xf32, #tpu.memory_space<vmem>>, vector<1x4x256xf32>
    %4 = vector.shape_cast %3 : vector<1x4x256xf32> to vector<4x256xf32>
    %c0_3 = arith.constant 0 : index
    %c0_4 = arith.constant 0 : index
    %5 = vector.load %arg6[%c0_3, %c0_4] : memref<4x1xf32, #tpu.memory_space<vmem>>, vector<4x1xf32>
    %cst = arith.constant dense<0.000000e+00> : vector<4xf32>
    %6 = vector.multi_reduction <add>, %4, %cst [1] : vector<4x256xf32> to vector<4xf32>
    %7 = vector.shape_cast %6 : vector<4xf32> to vector<4x1xf32>
    %8 = arith.addf %5, %7 : vector<4x1xf32>
    %c0_5 = arith.constant 0 : index
    %c0_6 = arith.constant 0 : index
    %9 = vector.load %arg6[%c0_5, %c0_6] : memref<4x1xf32, #tpu.memory_space<vmem>>, vector<4x1xf32>
    tpu.vector_store %arg6[%c0_5, %c0_6], %8 {strides = array<i32>} : memref<4x1xf32, #tpu.memory_space<vmem>>, vector<4x1xf32>,
    %c0_i32_7 = arith.constant 0 : i32
    %10 = arith.cmpi eq, %arg1, %c0_i32_7 : i32
    %11 = arith.extui %10 : i1 to i32
    %c0_i32_8 = arith.constant 0 : i32
    %12 = arith.cmpi ne, %11, %c0_i32_8 : i32
    scf.if %12 {
      %c0_9 = arith.constant 0 : index
      %c0_10 = arith.constant 0 : index
      %13 = vector.load %arg6[%c0_9, %c0_10] : memref<4x1xf32, #tpu.memory_space<vmem>>, vector<4x1xf32>
      %cst_11 = arith.constant 3.906250e-03 : f32
      %14 = vector.broadcast %cst_11 : f32 to vector<4x1xf32>
      %15 = arith.mulf %13, %14 : vector<4x1xf32>
      %c0_12 = arith.constant 0 : index
      %c0_13 = arith.constant 0 : index
      %16 = vector.load %arg3[%c0_12, %c0_13] : memref<4x4xf32, #tpu.memory_space<vmem>>, vector<4x4xf32>
      %cst_14 = arith.constant dense<0.000000e+00> : vector<4x1xf32>
      %17 = tpu.matmul %16, %15, %cst_14 {dimension_numbers = #tpu.dot_dimension_numbers<[1], [0], [0], [1], [0, 0, 1, 1], [], []>} : vector<4x4xf32>, vector<4x1xf32>, vector<4x1xf32> -> vector<4x1xf32>
      %c0_15 = arith.constant 0 : index
      %c0_16 = arith.constant 0 : index
      %18 = vector.load %arg4[%c0_15, %c0_16] : memref<4x1xf32, #tpu.memory_space<vmem>>, vector<4x1xf32>
      %19 = arith.addf %17, %18 : vector<4x1xf32>
      %cst_17 = arith.constant 0.000000e+00 : f32
      %20 = vector.broadcast %cst_17 : f32 to vector<4x1xf32>
      %21 = arith.maximumf %19, %20 : vector<4x1xf32>
      %22 = vector.shape_cast %21 : vector<4x1xf32> to vector<4x1xf32>
      %23 = vector.broadcast %22 : vector<4x1xf32> to vector<4x256xf32>
      %c0_18 = arith.constant 0 : index
      %c0_19 = arith.constant 0 : index
      %c0_20 = arith.constant 0 : index
      %24 = vector.load %arg5[%c0_18, %c0_19, %c0_20] : memref<1x4x256xf32, #tpu.memory_space<vmem>>, vector<1x4x256xf32>
      %25 = vector.shape_cast %24 : vector<1x4x256xf32> to vector<4x256xf32>
      %26 = vector.shape_cast %23 : vector<4x256xf32> to vector<1x4x256xf32>
      tpu.vector_store %arg5[%c0_18, %c0_19, %c0_20], %26 {strides = array<i32>} : memref<1x4x256xf32, #tpu.memory_space<vmem>>, vector<1x4x256xf32>,
    } else {
    }
    return
  }
  func.func @transform_0(%arg0: i32, %arg1: i32) -> (i32, i32, i32) {
    %c0_i32 = arith.constant 0 : i32
    %c0_i32_0 = arith.constant 0 : i32
    return %arg0, %c0_i32, %arg1 : i32, i32, i32
  }
  func.func @transform_1(%arg0: i32, %arg1: i32) -> (i32, i32) {
    %c0_i32 = arith.constant 0 : i32
    %c0_i32_0 = arith.constant 0 : i32
    %c0_i32_1 = arith.constant 0 : i32
    return %c0_i32, %c0_i32_0 : i32, i32
  }
  func.func @transform_2(%arg0: i32, %arg1: i32) -> (i32, i32) {
    %c0_i32 = arith.constant 0 : i32
    %c0_i32_0 = arith.constant 0 : i32
    %c0_i32_1 = arith.constant 0 : i32
    return %c0_i32, %c0_i32_0 : i32, i32
  }
  func.func @transform_3(%arg0: i32, %arg1: i32) -> (i32, i32, i32) {
    %c0_i32 = arith.constant 0 : i32
    %c0_i32_0 = arith.constant 0 : i32
    %c0_i32_1 = arith.constant 0 : i32
    return %arg0, %c0_i32, %c0_i32_0 : i32, i32, i32
  }
}

</mosaic_0001>

<bundles_post_ra>
// kernel: tpu_custom_call.1
= control target key start
LH: loop header
LB: loop body
LE: loop exit
PB: predicated region body
PF: predicated region fallthrough
CT: control target
= control target key end

     0   :  { %8 = vsyncpa [#allocation4], 0  ;;  %s839_s0 = inlined_call_operand.hbm [shape: f32[2,4,256], index: 0, kind: input, shape index: {}]   ;;  %s840_s1 = inlined_call_operand.vmem [shape: f32[4,4], index: 1, kind: input, shape index: {}]   ;;  %s841_s2 = inlined_call_operand.vmem [shape: f32[4,1], index: 2, kind: input, shape index: {}]   ;;  %s842_s3 = inlined_call_operand.hbm [shape: f32[2,4,256], index: 3, kind: output, shape index: {}]  }
   0x1   :  { %10 = vsyncpa [#allocation4 + $0x1], 0 }
   0x2   :  { %11 = vsyncpa [#allocation5], 0 }
   0x3   :  { %13 = vsyncpa [#allocation5 + $0x1], 0  ;;  %s652_s12 = smov 0   ;;  %s654_s13 = smov 0  }
   0x4   :  { %s656_s14 = smov 0   ;;  %s658_s15 = smov 0  }
   0x5   :  { %s660_s16 = smov 0   ;;  %s662_s17 = smov 0  }
   0x6 LB: > { %s418_s18 = sadd.s32 4294967295, %s624_s17   ;;  %s419_s19 = sadd.s32 4294967294, %s624_s17   ;;  %s624_s17 = sphi %s662_s17, %s19_s17   ;;  %s620_s16 = sphi %s660_s16, %s858_s16   ;;  %s616_s15 = sphi %s658_s15, %s857_s15   ;;  %s612_s14 = sphi %s656_s14, %s856_s14   ;;  %s608_s13 = sphi %s654_s13, %s855_s13   ;;  %s604_s12 = sphi %s652_s12, %s854_s12  }
   0x7   : > { %s31_s20 = sadd.s32 1, %s620_s16  ;;  %s40_s21 = sadd.s32 1, %s612_s14 }
   0x8   : > { %p33_p0 = scmp.ge.s32.totalorder %s31_s20, 2  ;;  %p47_p1 = scmp.ne.s32.totalorder %s612_s14, %s608_s13 }
   0x9   : > { %p48_p2 = scmp.eq.s32.totalorder %s624_s17, 0  ;;  %p53_p3 = scmp.ne.s32.totalorder %s608_s13, %s604_s12 }
   0xa   : > { %s860_s20 = smov (%p33_p0, %s31_s20), 0  ;;  %p54_p5 = scmp.eq.s32.totalorder %s418_s18, 0 }
   0xb   : > { %p693_p4 = por %p48_p2, %p47_p1  ;;  %s35_s23 = ssub.s32 %s620_s16, %s860_s20 }
   0xc   : > { %p119_p6 = scmp.eq.s32.totalorder %s418_s18, 1  ;;  %p38_p7 = scmp.eq.s32.totalorder %s35_s23, 0 }
   0xd   : > { %p699_p8 = por %p54_p5, %p53_p3  ;;  %p125_p10 = scmp.eq.s32.totalorder %s419_s19, 1 }
   0xe   : > { %p703_p9 = por %p119_p6, %p47_p1  ;;  %p456_p13 = scmp.lt.s32.totalorder %s624_s17, 2 }
   0xf   : > { %s708_s26 = scalar_select %p38_p7, %s612_s14, %s40_s21  }
  0x10   : > { %s846_s25 = scalar_select %p703_p9, 1, 0 }
  0x11   : > { %p710_p11 = por %p125_p10, %p53_p3  ;;  %s151_s28 = sand.u32 1, %s612_s14  }
  0x12   : > { %s422_s29 = sshll.u32 %s151_s28, 3  ;;  %s435_s30 = sshll.u32 %s620_s16, 7 }
  0x13   : > { %s847_s27 = scalar_select %p710_p11, 1, 0 }
  0x14   : > { %s721_s6 = scalar_lea.hbm %s839_s0, %s435_s30  ;;  %s155_s7 = scalar_lea.vmem [#allocation3], %s422_s29 }
  0x15   : > { %s165_s8 = sshll.u32 %s155_s7, 4  ;;  %p727_p0 = pnand %p456_p13, %p693_p4  ;;  %s723_s8 = int_to_ptr.vmem [resolvable:$true] %s165_s8 }
  0x16   : > { %s152_s10 = scalar_lea.sflag [#allocation4], %s151_s28  ;;  %s512_s11 = scalar_lea.hbm %s721_s6, 128 }
  0x17   : > { %p513_p3 = scmp.ne.s32.totalorder %s721_s6, %s512_s11  ;;  %p514_p5 = pneg %p727_p0 }
  0x18   : > { %s517_s21 = scalar_lea.hbm %s839_s0, 256  ;;  %p518_p4 = scmp.lt.u32.totalorder %s721_s6, %s839_s0 }
  0x19   : > { %p515_p6 = pnand %p514_p5, %p513_p3  ;;  %p519_p10 = scmp.lt.u32.totalorder %s517_s21, %s512_s11 }
  0x1a   : > { %p521_p12 = scmp.lt.u32.totalorder %s512_s11, %s721_s6 }
  0x1b   : > { %p516_p7 = pneg %p515_p6  ;;  %p520_p13 = por %p519_p10, %p518_p4 }
  0x1d   : > { %p522_p1 = por %p521_p12, %p520_p13 }
  0x1f   : > { %p523_p2 = pnand %p522_p1, %p516_p7 }
  0x21   : > { %526 = shalt.err (!%p523_p2)
}
  0x22   : > { %s527_s28 = scalar_lea.vmem %s723_s8, 128  ;;  %s626_s29 = smov [#allocation3]  }
  0x23   : > { %p528_p3 = scmp.ne.s32.totalorder %s723_s8, %s527_s28  ;;  %s532_s30 = sshll.u32 %s626_s29, 4  ;;  %s533_s30 = int_to_ptr.vmem [resolvable:$false] %s532_s30 }
  0x24   : > { %s534_s4 = scalar_lea.vmem %s533_s30, 256  ;;  %p535_p9 = scmp.lt.s32.totalorder %s723_s8, %s533_s30 }
  0x25   : > { %p530_p6 = pnand %p528_p3, %p514_p5  ;;  %p536_p4 = scmp.lt.s32.totalorder %s534_s4, %s527_s28 }
  0x27   : > { %p531_p11 = pneg %p530_p6  ;;  %p537_p10 = por %p536_p4, %p535_p9 }
  0x29   : > { %p538_p12 = pnand %p537_p10, %p531_p11 }
  0x2b   : > { %541 = shalt.err (!%p538_p12)
}
  0x2c   : > { %451 = dma.hbm_to_vmem [thread:$0]  (!%p727_p0), %s721_s6, 128, %s723_s8, %s152_s10  }
  0x2d   : > { %p849_p1 = scmp.lt.s32.totalorder %s624_s17, 3  ;;  %p850_p2 = scmp.ge.s32.totalorder %s624_s17, 1 }
  0x2f   : > { %p171_p5 = pnand %p850_p2, %p849_p1 }
  0x30   : > { %s763_s5 = sand.u32 (!%p171_p5), 1, %s608_s13  }
  0x31   : > { %174 = sbr.rel (%p171_p5) target bundleno = 578 (0x242), region = 32  ;;  %s426_s7 = sshll.u32 (!%p171_p5), %s763_s5, 3 }
  0x32   : > { %s177_s11 = scalar_lea.sflag (!%p171_p5), [#allocation4], %s763_s5  ;;  %s180_s9 = scalar_lea.vmem (!%p171_p5), [#allocation3], %s426_s7 }
  0x38   : > { %595 = dma.done.wait (%p699_p8), %s177_s11, 128  }
  0x39   : > { %597 = vsyncadd (%p699_p8), %s177_s11, 4294967168  ;;  %vm208_vm0 = vcmask 3072   ;;  %v627_v0 = vmov 0.0   ;;  %vm215_vm1 = vcmask 1043456   ;;  %v210_v1 = vld [vmem:[%s180_s9] sm:$0xff]  ;;  %vm628_vm2 = vmmov 0  }
  0x3a   : > { %209 = vst.msk [vmem:[#allocation2] sm:$0xf] %vm208_vm0, %v627_v0  ;;  %439 = vmatprep.subr.mxu0 %v627_v0  ;;  %v213_v2 = vcombine.high %v210_v1, %v210_v1  ;;  %v216_v3 = vsel %vm215_vm1, %v210_v1, 0.0  ;;  %441 = vmatprep.mubr.msk.f32.mxu0 %vm628_vm2, %v627_v0  ;;  %v229_v11 = vld [vmem:[%s840_s1] sm:$0xf]  ;;  %vm231_vm3 = vcmask 31744   ;;  %v316_v20 = vlaneseq }
  0x3b   : > { %v629_v12 = vmov 0   ;;  %v230_v13 = vld [vmem:[%s841_s2] sm:$0xf]  ;;  %v630_v18 = vmov 839922192   ;;  %s436_s18 = sshll.u32 %s616_s15, 7 }
  0x3c   : > { %v217_v4 = vsel %vm215_vm1, %v213_v2, 0.0  ;;  %510 = vset.pattern.permute.xlu0 %v629_v12  ;;  %v314_v19 = vunpack.c.l.s4 %v630_v18  ;;  %v317_v22 = vshrl.u32 %v316_v20, 7  ;;  %s202_s19 = scalar_lea.vmem [#allocation6], %s426_s7  ;;  %s790_s28 = scalar_lea.hbm %s842_s3, %s436_s18 }
  0x3d   : > { %v218_v5 = vadd.f32 %v217_v4, %v216_v3  ;;  %s337_s21 = sshll.u32 %s202_s19, 4  ;;  %s323_s29 = scalar_lea.sflag [#allocation5], %s763_s5  ;;  %s792_s21 = int_to_ptr.vmem [resolvable:$true] %s337_s21 }
  0x3e   : > { %v315_v21 = vunpack.c.0.s8 %v314_v19  ;;  %s542_s30 = scalar_lea.vmem %s792_s21, 128  ;;  %p851_p9 = scmp.ne.s32.totalorder %s846_s25, 0 }
  0x3f   : > { %219 = vadd.xlane.f32.xlu0 %v218_v5  ;;  %p543_p8 = scmp.ne.s32.totalorder %s792_s21, %s542_s30  ;;  %s631_s15 = smov [#allocation6]  }
  0x40   : > { %v318_v23 = vsub.s32 %v315_v21, %v317_v22  ;;  %s546_s4 = sshll.u32 %s631_s15, 4  ;;  %s547_s4 = int_to_ptr.vmem [resolvable:$false] %s546_s4 }
  0x41   : > { %v211_v6 = vld [vmem:[#allocation2] sm:$0xf]  ;;  %p544_p11 = pnand %p543_p8, %p851_p9  ;;  %s548_s7 = scalar_lea.vmem %s547_s4, 256 }
  0x42   : > { %p549_p7 = scmp.lt.s32.totalorder %s792_s21, %s547_s4  ;;  %p550_p13 = scmp.lt.s32.totalorder %s548_s7, %s542_s30 }
  0x43   : > { %p545_p0 = pneg %p544_p11 }
  0x44   : > { %p551_p3 = por %p550_p13, %p549_p7 }
  0x46   : > { %p552_p6 = pnand %p551_p3, %p545_p0 }
  0xcc   : > { %v220_v7 = vpop.xlane.xlu0 %219 }
  0xcd   : > { %v221_v8 = vadd.f32 %v220_v7, %v211_v6 }
  0xcf   : > { %223 = vst.msk [vmem:[#allocation2] sm:$0xf] %vm208_vm0, %v221_v8 }
  0xd6   : > { %v227_v9 = vld [vmem:[#allocation2] sm:$0xf] }
  0xd7   : > { %v228_v10 = vmul.f32 0.00390625, %v227_v9 }
  0xd9   : > { %440 = vmatpush3.msk.msra.mxu0 %vm215_vm1, %v228_v10 }
  0xda   : > { %442 = vmatmul.mubr.msk.f32.vlgmr.msra.gmra.mrb[0].mxu0 %vm231_vm3, %v229_v11 }
 0x1ad   : > { %v304_v14 = vpop.f32.mrb[0].mxu0 }
 0x1ae   : > { %v305_v15 = vadd.f32 %v304_v14, %v230_v13  ;;  %v443_v16 = vpop.f32.mrb[1].mxu0 }
 0x1b0   : > { %v308_v17 = vmax.f32 %v305_v15, 0.0 }
 0x1b2   : > { %311 = vperm.xlu0 %510, %v308_v17  }
 0x231   : > { %v312_v24 = vpop.permute.xlu0 %311 }
 0x232   : > { %v319_v25 = vrot.slane %v312_v24, %v318_v23 }
 0x234   : > { %321 = vst [vmem:[%s202_s19] sm:$0xff] %v319_v25 }
 0x235   : > { %555 = shalt.err (!%p552_p6)
}
 0x236   : > { %s556_s5 = scalar_lea.hbm %s790_s28, 128  ;;  %s560_s24 = scalar_lea.hbm %s842_s3, 256 }
 0x237   : > { %p557_p4 = scmp.ne.s32.totalorder %s790_s28, %s556_s5  ;;  %p561_p1 = scmp.lt.u32.totalorder %s790_s28, %s842_s3 }
 0x238   : > { %p562_p2 = scmp.lt.u32.totalorder %s560_s24, %s556_s5  ;;  %p564_p8 = scmp.lt.u32.totalorder %s556_s5, %s790_s28 }
 0x239   : > { %p558_p10 = pnand %p557_p4, %p851_p9 }
 0x23a   : > { %p563_p5 = por %p562_p2, %p561_p1 }
 0x23b   : > { %p559_p12 = pneg %p558_p10 }
 0x23c   : > { %p565_p11 = por %p564_p8, %p563_p5 }
 0x23e   : > { %p566_p0 = pnand %p565_p11, %p559_p12 }
 0x240   : > { %569 = shalt.err (!%p566_p0)
}
 0x241   : > { %446 = dma.vmem_to_hbm [thread:$0]  (%p851_p9), %s792_s21, 128, %s790_s28, %s323_s29  }
 0x242 PF: > { %s349_s10 = sand.u32 1, %s604_s12   ;;  %p852_p7 = scmp.ne.s32.totalorder %s847_s27, 0 }
 0x243   : > { %p853_p13 = scmp.ge.s32.totalorder %s624_s17, 2  ;;  %s350_s18 = scalar_lea.sflag [#allocation5], %s349_s10 }
 0x245   : > { %p453_p3 = pnand %p853_p13, %p852_p7 }
 0x247   : > { %599 = dma.done.wait (!%p453_p3), %s350_s18, 128  }
 0x248   : > { %601 = vsyncadd (!%p453_p3), %s350_s18, 4294967168  ;;  %s19_s17 = sadd.s32 1, %s624_s17   ;;  %s854_s12 = smov %s608_s13 }
 0x249   : > { %p16_p6 = scmp.ge.s32.totalorder %s19_s17, 4   ;;  %s855_s13 = smov %s612_s14 }
 0x24a   : > { %s856_s14 = smov %s708_s26  ;;  %s857_s15 = smov %s620_s16 }
 0x24b   : > { %s858_s16 = smov %s860_s20  ;;  %18 = sbr.rel (!%p16_p6) target bundleno = 6 (0x6), region = 85 }
 0x252   :  { %355 = vsyncpa [#allocation4], 1 }
 0x253   :  { %357 = vsyncpa [#allocation4 + $0x1], 1 }
 0x254   :  { %358 = vsyncpa [#allocation5], 1 }
 0x255   :  { %360 = vsyncpa [#allocation5 + $0x1], 1 }

</bundles_post_ra>
